<compile_context>
chip_gen: v7x
topology: tpu7x:2x2x1
jax: 0.10.0
libtpu: 0.0.40
codegen_flags: <defaults>
</compile_context>

<pallas_src>
import jax
import jax.numpy as jnp
from jax.experimental import pallas as pl
from jax.experimental.pallas import tpu as pltpu


def linear_kernel(x_ref, w_ref, b_ref, o_ref):
    # x_ref: (tb, 784) bf16 streamed per tile; w_ref: (784, 10) bf16 resident;
    # b_ref: (1, 10) f32 resident.  f32 accumulation on the MXU.
    acc = jnp.dot(x_ref[...], w_ref[...], preferred_element_type=jnp.float32)
    o_ref[...] = (acc + b_ref[...]).astype(o_ref.dtype)


def _round_up(v, m):
    return (v + m - 1) // m * m


def mnist_logistic_forward(x, weight, bias, *, tile_b=2048,
                           compute_dtype=jnp.bfloat16,
                           min_pallas_batch=1024):
    """Forward of nn.Linear(784, 10).

    x: (B, 784) f32; weight: (10, 784) f32 (PyTorch layout); bias: (10,) f32.
    Returns (B, 10) f32 logits.
    """
    B, D = x.shape
    O = weight.shape[0]

    # Tiny batches: a single fused XLA dot beats Pallas launch/DMA-setup cost.
    if B < min_pallas_batch:
        return (x.astype(jnp.float32) @ weight.T.astype(jnp.float32)
                + bias.astype(jnp.float32))

    # Sublane-aligned batch tile (bf16 packs 16 rows per vreg sublane group).
    sublane = 16 if compute_dtype == jnp.bfloat16 else 8
    tb = min(tile_b, B)
    if B >= 2 * sublane:
        # Guarantee >= 2 grid tiles so the "parallel" batch axis can shard
        # across v7x's two TensorCores (no-op on single-TC v5e/v6e).
        tb = min(tb, _round_up(pl.cdiv(B, 2), sublane))
    tb = max(sublane, _round_up(tb, sublane))

    n_tiles = pl.cdiv(B, tb)
    B_pad = n_tiles * tb

    x_in = x.astype(compute_dtype)
    if B_pad != B:
        x_in = jnp.pad(x_in, ((0, B_pad - B), (0, 0)))

    # One-time wrapper-side transpose + cast: resident (784, 10) operand so the
    # per-tile body is a pure MXU feed (no per-step weight transpose).
    w_t = weight.T.astype(compute_dtype)          # (784, 10)
    b2d = bias.reshape(1, O).astype(jnp.float32)  # (1, 10) for in-kernel broadcast

    out = pl.pallas_call(
        linear_kernel,
        out_shape=jax.ShapeDtypeStruct((B_pad, O), jnp.float32),
        grid_spec=pltpu.PrefetchScalarGridSpec(
            num_scalar_prefetch=0,
            grid=(n_tiles,),
            in_specs=[
                pl.BlockSpec((tb, D), lambda i: (i, 0)),  # x: streamed per batch tile
                pl.BlockSpec((D, O), lambda i: (0, 0)),   # weight: VMEM-resident
                pl.BlockSpec((1, O), lambda i: (0, 0)),   # bias: VMEM-resident
            ],
            out_specs=pl.BlockSpec((tb, O), lambda i: (i, 0)),
        ),
        compiler_params=pltpu.CompilerParams(
            dimension_semantics=("parallel",),
            vmem_limit_bytes=32 << 20,
        ),
    )(x_in, w_t, b2d)

    if B_pad != B:
        out = out[:B]
    return out


if __name__ == "__main__":
    key = jax.random.PRNGKey(0)
    kx, kw, kb = jax.random.split(key, 3)

    in_features, out_features = 784, 10

    # Deterministic synthetic params (same shapes as nn.Linear(784, 10)).
    bound = 1.0 / (in_features ** 0.5)
    weight = jax.random.uniform(kw, (out_features, in_features),
                                minval=-bound, maxval=bound, dtype=jnp.float32)
    bias = jax.random.uniform(kb, (out_features,),
                              minval=-bound, maxval=bound, dtype=jnp.float32)

    def reference(x):
        return x @ weight.T + bias

    # bf16 input stream vs f32 reference -> relaxed tolerance.
    ATOL = RTOL = 3e-2

    # 1) Module's own batch size (bs=64). Force the Pallas path so the kernel is
    #    exercised (tb=32 -> 2 tiles, also covers the v7x two-TC split logic).
    x64 = jax.random.normal(kx, (64, in_features), dtype=jnp.float32)
    out64 = mnist_logistic_forward(x64, weight, bias, min_pallas_batch=0)
    jax.block_until_ready(out64)
    assert out64.shape == (64, out_features)
    assert jnp.allclose(out64, reference(x64), atol=ATOL, rtol=RTOL)

    # 2) Larger batch that takes the default Pallas path (tb=1024, 2 tiles).
    x_big = jax.random.normal(jax.random.fold_in(kx, 1), (2048, in_features),
                              dtype=jnp.float32)
    out_big = mnist_logistic_forward(x_big, weight, bias)
    jax.block_until_ready(out_big)
    assert out_big.shape == (2048, out_features)
    assert jnp.allclose(out_big, reference(x_big), atol=ATOL, rtol=RTOL)

    # 3) Non-multiple batch to exercise the pad/slice path through Pallas.
    x_odd = jax.random.normal(jax.random.fold_in(kx, 2), (100, in_features),
                              dtype=jnp.float32)
    out_odd = mnist_logistic_forward(x_odd, weight, bias, min_pallas_batch=0)
    jax.block_until_ready(out_odd)
    assert out_odd.shape == (100, out_features)
    assert jnp.allclose(out_odd, reference(x_odd), atol=ATOL, rtol=RTOL)

    print("KERNEL_OK")
</pallas_src>

<mosaic_0001>
module attributes {stable_mosaic.version = 11 : i64} {
  func.func @linear_kernel(%arg0: i32, %arg1: memref<32x784xbf16, #tpu.memory_space<vmem>>, %arg2: memref<784x10xbf16, #tpu.memory_space<vmem>>, %arg3: memref<1x10xf32, #tpu.memory_space<vmem>>, %arg4: memref<32x10xf32, #tpu.memory_space<vmem>>) attributes {dimension_semantics = [#tpu.dimension_semantics<parallel>], iteration_bounds = array<i64: 2>, scalar_prefetch = 0 : i64, scratch_operands = 0 : i64, tpu.core_type = #tpu.core_type<tc>, window_params = [{transform_indices = @transform_0, window_bounds = array<i64: 32, 784>}, {pipeline_mode = #tpu.pipeline_mode<synchronous>, transform_indices = @transform_1, window_bounds = array<i64: 784, 10>}, {pipeline_mode = #tpu.pipeline_mode<synchronous>, transform_indices = @transform_2, window_bounds = array<i64: 1, 10>}, {transform_indices = @transform_3, window_bounds = array<i64: 32, 10>}]} {
    %c0 = arith.constant 0 : index
    %c0_0 = arith.constant 0 : index
    %0 = vector.load %arg1[%c0, %c0_0] : memref<32x784xbf16, #tpu.memory_space<vmem>>, vector<32x784xbf16>
    %c0_1 = arith.constant 0 : index
    %c0_2 = arith.constant 0 : index
    %1 = vector.load %arg2[%c0_1, %c0_2] : memref<784x10xbf16, #tpu.memory_space<vmem>>, vector<784x10xbf16>
    %cst = arith.constant dense<0.000000e+00> : vector<32x10xf32>
    %2 = tpu.matmul %0, %1, %cst {dimension_numbers = #tpu.dot_dimension_numbers<[1], [0], [0], [1], [0, 0, 1, 1], [], []>} : vector<32x784xbf16>, vector<784x10xbf16>, vector<32x10xf32> -> vector<32x10xf32>
    %c0_3 = arith.constant 0 : index
    %c0_4 = arith.constant 0 : index
    %3 = vector.load %arg3[%c0_3, %c0_4] : memref<1x10xf32, #tpu.memory_space<vmem>>, vector<1x10xf32>
    %4 = vector.broadcast %3 : vector<1x10xf32> to vector<32x10xf32>
    %5 = arith.addf %2, %4 : vector<32x10xf32>
    %c0_5 = arith.constant 0 : index
    %c0_6 = arith.constant 0 : index
    %6 = vector.load %arg4[%c0_5, %c0_6] : memref<32x10xf32, #tpu.memory_space<vmem>>, vector<32x10xf32>
    tpu.vector_store %arg4[%c0_5, %c0_6], %5 {strides = array<i32>} : memref<32x10xf32, #tpu.memory_space<vmem>>, vector<32x10xf32>,
    return
  }
  func.func @transform_0(%arg0: i32) -> (i32, i32) {
    %c0_i32 = arith.constant 0 : i32
    %c0_i32_0 = arith.constant 0 : i32
    return %arg0, %c0_i32 : i32, i32
  }
  func.func @transform_1(%arg0: i32) -> (i32, i32) {
    %c0_i32 = arith.constant 0 : i32
    %c0_i32_0 = arith.constant 0 : i32
    %c0_i32_1 = arith.constant 0 : i32
    return %c0_i32, %c0_i32_0 : i32, i32
  }
  func.func @transform_2(%arg0: i32) -> (i32, i32) {
    %c0_i32 = arith.constant 0 : i32
    %c0_i32_0 = arith.constant 0 : i32
    %c0_i32_1 = arith.constant 0 : i32
    return %c0_i32, %c0_i32_0 : i32, i32
  }
  func.func @transform_3(%arg0: i32) -> (i32, i32) {
    %c0_i32 = arith.constant 0 : i32
    %c0_i32_0 = arith.constant 0 : i32
    return %arg0, %c0_i32 : i32, i32
  }
}

</mosaic_0001>

<bundles_post_ra>
// kernel: tpu_custom_call.1
= control target key start
LH: loop header
LB: loop body
LE: loop exit
PB: predicated region body
PF: predicated region fallthrough
CT: control target
= control target key end

     0   :  { %s1203_s12 = smov 0   ;;  %s1396_s0 = inlined_call_operand.vmem [shape: bf16[64,784], index: 0, kind: input, shape index: {}]   ;;  %s1397_s1 = inlined_call_operand.vmem [shape: bf16[784,10], index: 1, kind: input, shape index: {}]   ;;  %s1398_s2 = inlined_call_operand.vmem [shape: f32[1,10], index: 2, kind: input, shape index: {}]   ;;  %s1399_s3 = inlined_call_operand.vmem [shape: f32[64,10], index: 3, kind: output, shape index: {}]  }
   0x1 LB: > { %s927_s13 = sadd.s32 4294967295, %s1181_s12   ;;  %p931_p0 = scmp.ge.s32.totalorder %s1181_s12, 1  ;;  %s1181_s12 = sphi %s1203_s12, %s13_s12  }
   0x2   : > { %p139_p1 = scmp.lt.s32.totalorder %s1181_s12, 3 }
   0x4   : > { %p140_p2 = pnand %p931_p0, %p139_p1 }
   0x5   : > { %v1106_v0 = vld [vmem:[%s1397_s1 + $0x40] sm:$0xff] (!%p140_p2)   ;;  %v1110_v4 = vld [vmem:[%s1397_s1 + $0x48] sm:$0xff] (!%p140_p2)   ;;  %v1114_v8 = vld [vmem:[%s1397_s1 + $0x50] sm:$0xff] (!%p140_p2)   ;;  %s932_s17 = sshll.u32 (!%p140_p2), %s927_s13, 2  ;;  %vm663_vm0 = vcmask (!%p140_p2), 130048   ;;  %vm866_vm1 = vcmask (!%p140_p2), 80896  }
   0x6   : > { %143 = sbr.rel (%p140_p2) target bundleno = 300 (0x12c), region = 32  ;;  %v1107_v1 = vld [vmem:[%s1397_s1] sm:$0xff] (!%p140_p2)   ;;  %1004 = vmatprep.subr.bf16.mxu0 (!%p140_p2), %v1106_v0  ;;  %v1111_v5 = vld [vmem:[%s1397_s1 + $0x8] sm:$0xff] (!%p140_p2)   ;;  %v1115_v9 = vld [vmem:[%s1397_s1 + $0x10] sm:$0xff] (!%p140_p2)   ;;  %p165_p3 = scmp.lt.s32.totalorder (!%p140_p2), %s932_s17, 7 }
   0x7   : > { %v1108_v2 = vld [vmem:[%s1397_s1 + $0xc0] sm:$0xff] (!%p140_p2)   ;;  %1005 = vmatpush3.bf16.msra.mxu0 (!%p140_p2), %v1107_v1  ;;  %v1112_v6 = vld [vmem:[%s1397_s1 + $0xc8] sm:$0xff] (!%p140_p2)   ;;  %v1116_v10 = vld [vmem:[%s1397_s1 + $0xd0] sm:$0xff] (!%p140_p2)  }
   0x8   : > { %v1109_v3 = vld [vmem:[%s1397_s1 + $0x80] sm:$0xff] (!%p140_p2)   ;;  %1032 = vmatprep.subr.bf16.mxu1 (!%p140_p2), %v1108_v2  ;;  %1006 = vmatprep.subr.bf16.mxu0 (!%p140_p2), %v1110_v4  ;;  %v1113_v7 = vld [vmem:[%s1397_s1 + $0x88] sm:$0xff] (!%p140_p2)   ;;  %v1117_v11 = vld [vmem:[%s1397_s1 + $0x90] sm:$0xff] (!%p140_p2)  }
   0x9   : > { %1033 = vmatpush3.bf16.msra.mxu1 (!%p140_p2), %v1109_v3  ;;  %v1118_v12 = vld [vmem:[%s1397_s1 + $0x58] sm:$0xff] (!%p140_p2)   ;;  %v1122_v16 = vld [vmem:[%s1397_s1 + $0x60] sm:$0xff] (!%p140_p2)   ;;  %v1126_v20 = vld [vmem:[%s1397_s1 + $0x68] sm:$0xff] (!%p140_p2)  }
   0xa   : > { %1034 = vmatprep.subr.bf16.mxu1 (!%p140_p2), %v1112_v6  ;;  %v1119_v13 = vld [vmem:[%s1397_s1 + $0x18] sm:$0xff] (!%p140_p2)   ;;  %v1123_v17 = vld [vmem:[%s1397_s1 + $0x20] sm:$0xff] (!%p140_p2)   ;;  %v1127_v21 = vld [vmem:[%s1397_s1 + $0x28] sm:$0xff] (!%p140_p2)  }
   0xb   : > { %1007 = vmatpush3.bf16.msra.mxu0 (!%p140_p2), %v1111_v5  ;;  %v1120_v14 = vld [vmem:[%s1397_s1 + $0xd8] sm:$0xff] (!%p140_p2)   ;;  %v1124_v18 = vld [vmem:[%s1397_s1 + $0xe0] sm:$0xff] (!%p140_p2)   ;;  %v1128_v22 = vld [vmem:[%s1397_s1 + $0xe8] sm:$0xff] (!%p140_p2)  }
   0xc   : > { %1008 = vmatprep.subr.bf16.mxu0 (!%p140_p2), %v1114_v8  ;;  %v1121_v15 = vld [vmem:[%s1397_s1 + $0x98] sm:$0xff] (!%p140_p2)   ;;  %v1125_v19 = vld [vmem:[%s1397_s1 + $0xa0] sm:$0xff] (!%p140_p2)   ;;  %v1129_v23 = vld [vmem:[%s1397_s1 + $0xa8] sm:$0xff] (!%p140_p2)  }
   0xd   : > { %1035 = vmatpush3.bf16.msra.mxu1 %v1113_v7  ;;  %s1401_s17 = smov (!%p165_p3, %s932_s17), 7  ;;  %v1130_v24 = vld [vmem:[%s1397_s1 + $0x70] sm:$0xff]   ;;  %v1134_v28 = vld [vmem:[%s1397_s1 + $0x78] sm:$0xff]   ;;  %v1141_v34 = vld [vmem:[%s1397_s1 + $0x140] sm:$0xff]  }
   0xe   : > { %1036 = vmatprep.subr.bf16.mxu1 %v1116_v10  ;;  %s1097_s14 = smul.u32 28, %s1401_s17  ;;  %v1131_v25 = vld [vmem:[%s1397_s1 + $0x30] sm:$0xff]   ;;  %v1135_v29 = vld [vmem:[%s1397_s1 + $0x38] sm:$0xff]   ;;  %v1145_v37 = vld [vmem:[%s1397_s1 + $0x100] sm:$0xff]  }
   0xf   : > { %1009 = vmatpush3.bf16.msra.mxu0 %v1115_v9  ;;  %v1132_v26 = vld [vmem:[%s1397_s1 + $0xf0] sm:$0xff]   ;;  %v1136_v30 = vld [vmem:[%s1397_s1 + $0xf8] sm:$0xff]   ;;  %v1146_v38 = vld [vmem:[%s1397_s1 + $0x148] sm:$0xff]  }
  0x10   : > { %1010 = vmatprep.subr.bf16.mxu0 %v1118_v12  ;;  %v1133_v27 = vld [vmem:[%s1397_s1 + $0xb0] sm:$0xff]   ;;  %s1306_s13 = scalar_lea.vmem %s1396_s0, %s1097_s14  ;;  %v1140_v33 = vld [vmem:[%s1397_s1 + $0xb8] sm:$0xff]   ;;  %v1147_v39 = vld [vmem:[%s1397_s1 + $0x108] sm:$0xff]  }
  0x11   : > { %1037 = vmatpush3.bf16.msra.mxu1 %v1117_v11  ;;  %v1137_v31 = vld [vmem:[%s1306_s13] ss:$28 sps:$4 sm:$0xff]   ;;  %v1142_v35 = vld [vmem:[%s1306_s13 + $0x8] ss:$28 sps:$4 sm:$0xff]   ;;  %v1148_v40 = vld [vmem:[%s1397_s1 + $0x150] sm:$0xff]  }
  0x12   : > { %1038 = vmatprep.subr.bf16.mxu1 %v1120_v14  ;;  %v1139_v32 = vld [vmem:[%s1306_s13 + $0x4] ss:$28 sps:$4 sm:$0xff]   ;;  %v1144_v36 = vld [vmem:[%s1306_s13 + $0xc] ss:$28 sps:$4 sm:$0xff]   ;;  %v1149_v41 = vld [vmem:[%s1397_s1 + $0x110] sm:$0xff]  }
  0x13   : > { %1011 = vmatpush3.bf16.msra.mxu0 %v1119_v13  ;;  %702 = vmatprep.mubr.bf16.mxu0 %v1139_v32  ;;  %v1150_v42 = vld [vmem:[%s1397_s1 + $0x158] sm:$0xff]   ;;  %v1152_v46 = vld [vmem:[%s1397_s1 + $0x160] sm:$0xff]   ;;  %v1156_v50 = vld [vmem:[%s1397_s1 + $0x168] sm:$0xff]  }
  0x14   : > { %1012 = vmatprep.subr.bf16.mxu0 %v1122_v16  ;;  %751 = vmatprep.mubr.bf16.mxu1 %v1144_v36  ;;  %v1154_v43 = vld [vmem:[%s1306_s13 + $0x3c] ss:$28 sps:$4 sm:$0xff]   ;;  %v1159_v47 = vld [vmem:[%s1306_s13 + $0x44] ss:$28 sps:$4 sm:$0xff]   ;;  %v1158_v52 = vld [vmem:[%s1397_s1 + $0x128] sm:$0xff]  }
  0x15   : > { %1039 = vmatpush3.bf16.msra.mxu1 %v1121_v15  ;;  %v1151_v44 = vld [vmem:[%s1397_s1 + $0x118] sm:$0xff]   ;;  %v1153_v49 = vld [vmem:[%s1397_s1 + $0x120] sm:$0xff]   ;;  %v1162_v53 = vld [vmem:[%s1397_s1 + $0x170] sm:$0xff]  }
  0x16   : > { %1040 = vmatprep.subr.bf16.mxu1 %v1124_v18  ;;  %v1157_v45 = vld [vmem:[%s1306_s13 + $0x38] ss:$28 sps:$4 sm:$0xff]   ;;  %v1161_v48 = vld [vmem:[%s1306_s13 + $0x40] ss:$28 sps:$4 sm:$0xff]   ;;  %v1171_v56 = vld [vmem:[%s1306_s13 + $0x50] ss:$28 sps:$4 sm:$0xff]  }
  0x17   : > { %1013 = vmatpush3.bf16.msra.mxu0 %v1123_v17  ;;  %v1164_v51 = vld [vmem:[%s1397_s1 + $0x180] sm:$0xff]   ;;  %v1169_v54 = vld [vmem:[%s1306_s13 + $0x14] ss:$28 sps:$4 sm:$0xff]   ;;  %v1165_v58 = vld [vmem:[%s1397_s1 + $0x178] sm:$0xff]  }
  0x18   : > { %1014 = vmatprep.subr.bf16.mxu0 %v1126_v20  ;;  %v1170_v55 = vld [vmem:[%s1306_s13 + $0x18] ss:$28 sps:$4 sm:$0xff]   ;;  %v1167_v60 = vld [vmem:[%s1306_s13 + $0x10] ss:$28 sps:$4 sm:$0xff]   ;;  %v1174_v62 = vld [vmem:[%s1306_s13 + $0x48] ss:$28 sps:$4 sm:$0xff]  }
  0x19   : > { %1041 = vmatpush3.bf16.msra.mxu1 %v1125_v19  ;;  %v1163_v57 = vld [vmem:[%s1397_s1 + $0x130] sm:$0xff]   ;;  %v1166_v59 = vld [vmem:[%s1397_s1 + $0x138] sm:$0xff]   ;;  %v1172_v61 = vld [vmem:[%s1306_s13 + $0x4c] ss:$28 sps:$4 sm:$0xff]   ;;  %s935_s13 = sshll.u32 %s1401_s17, 3 }
  0x1a   : > { %1042 = vmatprep.subr.bf16.mxu1 %v1128_v22  ;;  %v936_v0 = vld [vmem:[%s1398_s2] ss:$0 sm:$0xff]  ;;  %s175_s22 = scalar_lea.vmem %s1399_s3, %s935_s13 }
  0x1b   : > { %1015 = vmatpush3.bf16.msra.mxu0 %v1127_v21 }
  0x1c   : > { %1016 = vmatprep.subr.bf16.mxu0 %v1130_v24 }
  0x1d   : > { %1043 = vmatpush3.bf16.msra.mxu1 %v1129_v23 }
  0x1e   : > { %1044 = vmatprep.subr.bf16.mxu1 %v1132_v26 }
  0x1f   : > { %1017 = vmatpush3.bf16.msra.mxu0 %v1131_v25 }
  0x20   : > { %1018 = vmatprep.subr.bf16.mxu0 %v1134_v28 }
  0x21   : > { %1045 = vmatpush3.bf16.msra.mxu1 %v1133_v27 }
  0x22   : > { %1046 = vmatprep.subr.bf16.mxu1 %v1136_v30 }
  0x23   : > { %1019 = vmatpush3.bf16.msra.mxu0 %v1135_v29 }
  0x24   : > { %1060 = vmatprep.subr.bf16.mxu0 %v1141_v34 }
  0x25   : > { %1047 = vmatpush3.bf16.msra.mxu1 %v1140_v33 }
  0x26   : > { %703 = vmatmul.mubr.bf16.vlgmr.msra.gmra.mrb[0].mxu0 %v1137_v31  ;;  %1091 = vmatprep.subr.bf16.mxu1 %v1164_v51 }
  0x27   : > { %1061 = vmatpush3.bf16.msra.mxu0 %v1145_v37  ;;  %710 = vmatprep.mubr.bf16.mxu0 %v1154_v43 }
  0x28   : > { %752 = vmatmul.mubr.bf16.vlgmr.msra.gmra.mrb[0].mxu1 %v1142_v35  ;;  %1062 = vmatprep.subr.bf16.mxu0 %v1146_v38 }
  0x29   : > { %759 = vmatprep.mubr.bf16.mxu1 %v1159_v47  ;;  %1092 = vmatpush3.bf16.msra.mxu1 %v1164_v51 }
  0x2b   : > { %1063 = vmatpush3.bf16.msra.mxu0 %v1147_v39 }
  0x2c   : > { %1064 = vmatprep.subr.bf16.mxu0 %v1148_v40 }
  0x2e   : > { %711 = vmatmul.mubr.bf16.gmra.mrb[4].mxu0 %v1157_v45 }
  0x2f   : > { %1065 = vmatpush3.bf16.msra.mxu0 %v1149_v41  ;;  %800 = vmatprep.mubr.bf16.mxu0 %v1169_v54 }
  0x30   : > { %1066 = vmatprep.subr.bf16.mxu0 %v1150_v42  ;;  %760 = vmatmul.mubr.bf16.gmra.mrb[4].mxu1 %v1161_v48 }
  0x31   : > { %1093 = vmatprep.mubr.msk.bf16.mxu1 %vm663_vm0, %v1170_v55 }
  0x33   : > { %1067 = vmatpush3.bf16.msra.mxu0 %v1151_v44 }
  0x34   : > { %1068 = vmatprep.subr.bf16.mxu0 %v1152_v46 }
  0x37   : > { %1069 = vmatpush3.bf16.msra.mxu0 %v1153_v49 }
  0x38   : > { %1070 = vmatprep.subr.bf16.mxu0 %v1156_v50  ;;  %1094 = vmatmul.mubr.msk.bf16.vlgmr.msra.gmra.mrb[8].mxu1 %vm663_vm0, %v1171_v56 }
  0x3b   : > { %1071 = vmatpush3.bf16.msra.mxu0 %v1158_v52 }
  0x3c   : > { %1072 = vmatprep.subr.bf16.mxu0 %v1162_v53 }
  0x3f   : > { %1073 = vmatpush3.bf16.msra.mxu0 %v1163_v57 }
  0x40   : > { %1074 = vmatprep.subr.bf16.mxu0 %v1165_v58 }
  0x43   : > { %1075 = vmatpush3.bf16.msra.mxu0 %v1166_v59 }
  0x46   : > { %801 = vmatmul.mubr.bf16.vlgmr.msra.gmra.mrb[8].mxu0 %v1167_v60 }
  0x47   : > { %808 = vmatprep.mubr.bf16.mxu0 %v1172_v61 }
  0x4e   : > { %809 = vmatmul.mubr.bf16.gmra.mrb[12].mxu0 %v1174_v62 }
  0xf9   : > { %v1020_v63 = vpop.f32.mrb[0].mxu0 }
  0xfa   : > { %v1021_v1 = vpop.f32.mrb[1].mxu0 }
  0xfb   : > { %v1022_v2 = vadd.f32 %v1021_v1, %v1020_v63  ;;  %v1023_v3 = vpop.f32.mrb[2].mxu0  ;;  %v1048_v4 = vpop.f32.mrb[0].mxu1 }
  0xfc   : > { %v1024_v5 = vpop.f32.mrb[3].mxu0  ;;  %v1049_v8 = vpop.f32.mrb[1].mxu1 }
  0xfd   : > { %v705_v6 = vadd.f32 %v1022_v2, %v936_v0  ;;  %v1025_v7 = vadd.f32 %v1024_v5, %v1023_v3  ;;  %v1050_v9 = vadd.f32 %v1049_v8, %v1048_v4  ;;  %v1051_v10 = vpop.f32.mrb[2].mxu1 }
  0xfe   : > { %v1052_v12 = vpop.f32.mrb[3].mxu1 }
  0xff   : > { %v708_v11 = vadd.f32 %v1025_v7, %v936_v0  ;;  %v754_v13 = vadd.f32 %v1050_v9, %v705_v6  ;;  %v1053_v14 = vadd.f32 %v1052_v12, %v1051_v10 }
 0x101   : > { %v757_v15 = vadd.f32 %v1053_v14, %v708_v11  ;;  %v1026_v16 = vpop.f32.mrb[4].mxu0 }
 0x102   : > { %v1027_v17 = vpop.f32.mrb[5].mxu0 }
 0x103   : > { %v1028_v18 = vadd.f32 %v1027_v17, %v1026_v16  ;;  %v1029_v19 = vpop.f32.mrb[6].mxu0  ;;  %v1054_v20 = vpop.f32.mrb[4].mxu1 }
 0x104   : > { %v1030_v21 = vpop.f32.mrb[7].mxu0  ;;  %v1055_v24 = vpop.f32.mrb[5].mxu1 }
 0x105   : > { %v713_v22 = vadd.f32 %v1028_v18, %v936_v0  ;;  %v1031_v23 = vadd.f32 %v1030_v21, %v1029_v19  ;;  %v1056_v25 = vadd.f32 %v1055_v24, %v1054_v20  ;;  %v1057_v26 = vpop.f32.mrb[6].mxu1 }
 0x106   : > { %v1058_v28 = vpop.f32.mrb[7].mxu1 }
 0x107   : > { %v716_v27 = vadd.f32 %v1031_v23, %v936_v0  ;;  %v762_v29 = vadd.f32 %v1056_v25, %v713_v22  ;;  %v1059_v30 = vadd.f32 %v1058_v28, %v1057_v26 }
 0x109   : > { %v765_v31 = vadd.f32 %v1059_v30, %v716_v27 }
 0x10b   : > { %v1095_v32 = vpop.f32.mrb[8].mxu1 }
 0x10c   : > { %v851_v33 = vpop.f32.mrb[9].mxu1 }
 0x10d   : > { %v1096_v34 = vpop.f32.mrb[10].mxu1 }
 0x10e   : > { %v854_v35 = vpop.f32.mrb[11].mxu1 }
 0x119   : > { %v1076_v36 = vpop.f32.mrb[8].mxu0 }
 0x11a   : > { %v1077_v37 = vpop.f32.mrb[9].mxu0 }
 0x11b   : > { %v1078_v38 = vadd.f32 %v1077_v37, %v1076_v36  ;;  %v1079_v39 = vpop.f32.mrb[10].mxu0 }
 0x11c   : > { %v1080_v40 = vpop.f32.mrb[11].mxu0 }
 0x11d   : > { %v1081_v41 = vadd.f32 %v1080_v40, %v1079_v39  ;;  %v803_v42 = vadd.f32 %v1078_v38, %v754_v13 }
 0x11f   : > { %v852_v43 = vadd.f32 %v851_v33, %v803_v42  ;;  %v806_v44 = vadd.f32 %v1081_v41, %v757_v15 }
 0x121   : > { %867 = vst.msk [vmem:[%s175_s22] sm:$0xff] %vm866_vm1, %v852_v43  ;;  %v855_v45 = vadd.f32 %v854_v35, %v806_v44  ;;  %v1082_v46 = vpop.f32.mrb[12].mxu0 }
 0x122   : > { %v1083_v47 = vpop.f32.mrb[13].mxu0 }
 0x123   : > { %868 = vst.msk [vmem:[%s175_s22 + $0x8] sm:$0xff] %vm866_vm1, %v855_v45  ;;  %v1084_v48 = vadd.f32 %v1083_v47, %v1082_v46  ;;  %v1085_v49 = vpop.f32.mrb[14].mxu0 }
 0x124   : > { %v1086_v50 = vpop.f32.mrb[15].mxu0 }
 0x125   : > { %v811_v51 = vadd.f32 %v1084_v48, %v762_v29  ;;  %v1087_v52 = vadd.f32 %v1086_v50, %v1085_v49 }
 0x127   : > { %v860_v53 = vadd.f32 %v1095_v32, %v811_v51  ;;  %v814_v54 = vadd.f32 %v1087_v52, %v765_v31 }
 0x129   : > { %869 = vst.msk [vmem:[%s175_s22 + $0x10] sm:$0xff] %vm866_vm1, %v860_v53  ;;  %v863_v55 = vadd.f32 %v1096_v34, %v814_v54 }
 0x12b   : > { %870 = vst.msk [vmem:[%s175_s22 + $0x18] sm:$0xff] %vm866_vm1, %v863_v55 }
 0x12c PF: > { %s13_s12 = sadd.s32 1, %s1181_s12  }
 0x12d   : > { %p10_p4 = scmp.ge.s32.totalorder %s13_s12, 4  }
 0x12f   :  { %12 = sbr.rel (!%p10_p4) target bundleno = 1 (0x1), region = 62 }

</bundles_post_ra>
